<compile_context>
chip_gen: v7x
topology: tpu7x:2x2x1
jax: 0.10.0
libtpu: 0.0.40
codegen_flags: <defaults>
</compile_context>

<pallas_src>
import functools

import jax
import jax.numpy as jnp
from jax.experimental import pallas as pl
from jax.experimental.pallas import tpu as pltpu


def mlp_kernel(x_ref, w1_ref, b1_ref, w2_ref, b2_ref, o_ref, *, ew_dtype):
    # In-kernel cast of x to bf16 (rides otherwise-idle VPU slots; avoids a
    # separate wrapper-side astype pass over x in HBM).
    x = x_ref[...].astype(jnp.bfloat16)
    # (tile_b, 10) bf16 @ (10, 200) bf16 -> f32 accumulation on the MXU.
    h = jnp.dot(x, w1_ref[...], preferred_element_type=jnp.float32)
    # Bias + ReLU in ew_dtype (bf16 on v6e/v7x, f32 on v5e).
    h = jnp.maximum(h.astype(ew_dtype) + b1_ref[...], 0)
    # Tiny second layer (200 x 4), f32 accumulation; bias add in f32.
    y = jnp.dot(h, w2_ref[...], preferred_element_type=jnp.float32) + b2_ref[...]
    # Direct (tile_b, 4) store: no in-kernel transpose, no wrapper transpose.
    o_ref[...] = y.astype(o_ref.dtype)


def _round_up(v, m):
    return ((v + m - 1) // m) * m


def _elementwise_dtype():
    """bf16 elementwise path only where the VPU is natively bf16 (v6e / v7x)."""
    try:
        kind = jax.devices()[0].device_kind.lower()
    except Exception:
        return jnp.float32
    if ("v6" in kind) or ("v7" in kind) or ("7x" in kind):
        return jnp.bfloat16
    return jnp.float32


def _select_tile_b(B, max_tile_b):
    if B < 256:
        return B                                        # single full-extent block
    if B <= max_tile_b:
        # At least 2 grid steps so v7x can use both TensorCores.
        return min(max_tile_b, _round_up(pl.cdiv(B, 2), 128))
    return max_tile_b


def net_forward(x, w1, b1, w2, b2, *, tile_b=None, max_tile_b=4096):
    """Forward pass of Net.  x: (B, 10) float.  Returns (B, 4) float32.

    Weights are stored (in_features, out_features), i.e. transposed vs. the
    PyTorch nn.Linear (out, in) layout, so the kernel computes x @ W + b."""
    B, in_dim = x.shape
    hidden = w1.shape[1]
    out_dim = w2.shape[1]

    ew_dtype = _elementwise_dtype()

    if tile_b is None:
        tile_b = _select_tile_b(B, max_tile_b)
    if tile_b >= B:
        tile_b = B                      # single block; full-extent dims are legal
    else:
        assert tile_b % 8 == 0, "tile_b must be a multiple of 8 when tiling the batch"
    grid = (pl.cdiv(B, tile_b),)

    x = x.astype(jnp.float32)
    w1b = w1.astype(jnp.bfloat16)                       # tiny one-time weight cast
    b1e = b1.reshape(1, hidden).astype(ew_dtype)
    w2e = w2.astype(ew_dtype)
    b2f = b2.reshape(1, out_dim).astype(jnp.float32)

    ew_bytes = jnp.dtype(ew_dtype).itemsize
    cost = pl.CostEstimate(
        flops=2 * B * (in_dim * hidden + hidden * out_dim),
        transcendentals=0,
        bytes_accessed=(B * in_dim * 4                  # x (f32, cast in-kernel)
                        + in_dim * hidden * 2           # w1 (bf16)
                        + (hidden * out_dim + hidden) * ew_bytes   # w2, b1
                        + out_dim * 4                   # b2
                        + B * out_dim * 4),             # output (f32)
    )

    kernel = functools.partial(mlp_kernel, ew_dtype=ew_dtype)

    out = pl.pallas_call(
        kernel,
        out_shape=jax.ShapeDtypeStruct((B, out_dim), jnp.float32),
        grid_spec=pltpu.PrefetchScalarGridSpec(
            num_scalar_prefetch=0,
            grid=grid,
            in_specs=[
                pl.BlockSpec((tile_b, in_dim), lambda i: (i, 0)),    # x: streamed per tile
                pl.BlockSpec((in_dim, hidden), lambda i: (0, 0)),    # w1: VMEM-resident
                pl.BlockSpec((1, hidden), lambda i: (0, 0)),         # b1: VMEM-resident
                pl.BlockSpec((hidden, out_dim), lambda i: (0, 0)),   # w2: VMEM-resident
                pl.BlockSpec((1, out_dim), lambda i: (0, 0)),        # b2: VMEM-resident
            ],
            out_specs=pl.BlockSpec((tile_b, out_dim), lambda i: (i, 0)),
        ),
        compiler_params=pltpu.CompilerParams(
            dimension_semantics=("parallel",),      # v7x: shard batch tiles over 2 TCs
            vmem_limit_bytes=32 * 1024 * 1024,      # explicit headroom (v5e default 16 MiB)
        ),
        cost_estimate=cost,
    )(x, w1b, b1e, w2e, b2f)
    return out


def init_params(key):
    """Deterministic init mimicking PyTorch nn.Linear default:
    uniform(-1/sqrt(fan_in), 1/sqrt(fan_in)).  Weights stored (in, out)."""
    k1, k2, k3, k4 = jax.random.split(key, 4)
    in1, out1 = 10, 200
    in2, out2 = 200, 4
    bound1 = 1.0 / jnp.sqrt(in1)
    bound2 = 1.0 / jnp.sqrt(in2)
    w1 = jax.random.uniform(k1, (in1, out1), jnp.float32, -bound1, bound1)
    b1 = jax.random.uniform(k2, (1, out1), jnp.float32, -bound1, bound1)
    w2 = jax.random.uniform(k3, (in2, out2), jnp.float32, -bound2, bound2)
    b2 = jax.random.uniform(k4, (1, out2), jnp.float32, -bound2, bound2)
    return w1, b1, w2, b2


if __name__ == "__main__":
    key = jax.random.PRNGKey(0)
    pkey, xkey = jax.random.split(key)
    w1, b1, w2, b2 = init_params(pkey)

    def reference(x):
        # Plain-JAX f32 reference, same math as the PyTorch forward.
        return jnp.maximum(x @ w1 + b1, 0.0) @ w2 + b2

    tol = dict(atol=3e-2, rtol=3e-2)   # bf16 first layer (and bf16 VPU on v6e/v7x)

    # Multi-tile case: B=256 -> auto tile 128 -> 2 pipelined / megacore grid steps.
    x = jax.random.normal(xkey, (256, 10), jnp.float32)
    out = net_forward(x, w1, b1, w2, b2)
    jax.block_until_ready(out)
    assert out.shape == (256, 4)
    assert jnp.allclose(out, reference(x), **tol)

    # Ragged-tail case: B=300 with explicit 128-row tiles -> 3 steps, last partial.
    x_rag = jax.random.normal(jax.random.fold_in(xkey, 1), (300, 10), jnp.float32)
    out_rag = net_forward(x_rag, w1, b1, w2, b2, tile_b=128)
    jax.block_until_ready(out_rag)
    assert out_rag.shape == (300, 4)
    assert jnp.allclose(out_rag, reference(x_rag), **tol)

    # Tiny-batch case (single-block path, full-extent blocks).
    x_small = jax.random.normal(jax.random.fold_in(xkey, 2), (8, 10), jnp.float32)
    out_small = net_forward(x_small, w1, b1, w2, b2)
    jax.block_until_ready(out_small)
    assert out_small.shape == (8, 4)
    assert jnp.allclose(out_small, reference(x_small), **tol)

    print("KERNEL_OK")
</pallas_src>

<mosaic_0001>
module attributes {stable_mosaic.version = 11 : i64} {
  func.func @mlp_kernel(%arg0: i32, %arg1: memref<128x10xf32, #tpu.memory_space<vmem>>, %arg2: memref<10x200xbf16, #tpu.memory_space<vmem>>, %arg3: memref<1x200xf32, #tpu.memory_space<vmem>>, %arg4: memref<200x4xf32, #tpu.memory_space<vmem>>, %arg5: memref<1x4xf32, #tpu.memory_space<vmem>>, %arg6: memref<128x4xf32, #tpu.memory_space<vmem>>) attributes {dimension_semantics = [#tpu.dimension_semantics<parallel>], iteration_bounds = array<i64: 2>, scalar_prefetch = 0 : i64, scratch_operands = 0 : i64, tpu.core_type = #tpu.core_type<tc>, window_params = [{transform_indices = @transform_0, window_bounds = array<i64: 128, 10>}, {pipeline_mode = #tpu.pipeline_mode<synchronous>, transform_indices = @transform_1, window_bounds = array<i64: 10, 200>}, {pipeline_mode = #tpu.pipeline_mode<synchronous>, transform_indices = @transform_2, window_bounds = array<i64: 1, 200>}, {pipeline_mode = #tpu.pipeline_mode<synchronous>, transform_indices = @transform_3, window_bounds = array<i64: 200, 4>}, {pipeline_mode = #tpu.pipeline_mode<synchronous>, transform_indices = @transform_4, window_bounds = array<i64: 1, 4>}, {transform_indices = @transform_5, window_bounds = array<i64: 128, 4>}]} {
    %c0 = arith.constant 0 : index
    %c0_0 = arith.constant 0 : index
    %0 = vector.load %arg1[%c0, %c0_0] : memref<128x10xf32, #tpu.memory_space<vmem>>, vector<128x10xf32>
    %1 = arith.truncf %0 : vector<128x10xf32> to vector<128x10xbf16>
    %c0_1 = arith.constant 0 : index
    %c0_2 = arith.constant 0 : index
    %2 = vector.load %arg2[%c0_1, %c0_2] : memref<10x200xbf16, #tpu.memory_space<vmem>>, vector<10x200xbf16>
    %cst = arith.constant dense<0.000000e+00> : vector<128x200xf32>
    %3 = tpu.matmul %1, %2, %cst {dimension_numbers = #tpu.dot_dimension_numbers<[1], [0], [0], [1], [0, 0, 1, 1], [], []>} : vector<128x10xbf16>, vector<10x200xbf16>, vector<128x200xf32> -> vector<128x200xf32>
    %c0_3 = arith.constant 0 : index
    %c0_4 = arith.constant 0 : index
    %4 = vector.load %arg3[%c0_3, %c0_4] : memref<1x200xf32, #tpu.memory_space<vmem>>, vector<1x200xf32>
    %5 = vector.broadcast %4 : vector<1x200xf32> to vector<128x200xf32>
    %6 = arith.addf %3, %5 : vector<128x200xf32>
    %cst_5 = arith.constant 0.000000e+00 : f32
    %7 = vector.broadcast %cst_5 : f32 to vector<128x200xf32>
    %8 = arith.maximumf %6, %7 : vector<128x200xf32>
    %c0_6 = arith.constant 0 : index
    %c0_7 = arith.constant 0 : index
    %9 = vector.load %arg4[%c0_6, %c0_7] : memref<200x4xf32, #tpu.memory_space<vmem>>, vector<200x4xf32>
    %cst_8 = arith.constant dense<0.000000e+00> : vector<128x4xf32>
    %10 = tpu.matmul %8, %9, %cst_8 {dimension_numbers = #tpu.dot_dimension_numbers<[1], [0], [0], [1], [0, 0, 1, 1], [], []>} : vector<128x200xf32>, vector<200x4xf32>, vector<128x4xf32> -> vector<128x4xf32>
    %c0_9 = arith.constant 0 : index
    %c0_10 = arith.constant 0 : index
    %11 = vector.load %arg5[%c0_9, %c0_10] : memref<1x4xf32, #tpu.memory_space<vmem>>, vector<1x4xf32>
    %12 = vector.broadcast %11 : vector<1x4xf32> to vector<128x4xf32>
    %13 = arith.addf %10, %12 : vector<128x4xf32>
    %c0_11 = arith.constant 0 : index
    %c0_12 = arith.constant 0 : index
    %14 = vector.load %arg6[%c0_11, %c0_12] : memref<128x4xf32, #tpu.memory_space<vmem>>, vector<128x4xf32>
    tpu.vector_store %arg6[%c0_11, %c0_12], %13 {strides = array<i32>} : memref<128x4xf32, #tpu.memory_space<vmem>>, vector<128x4xf32>,
    return
  }
  func.func @transform_0(%arg0: i32) -> (i32, i32) {
    %c0_i32 = arith.constant 0 : i32
    %c0_i32_0 = arith.constant 0 : i32
    return %arg0, %c0_i32 : i32, i32
  }
  func.func @transform_1(%arg0: i32) -> (i32, i32) {
    %c0_i32 = arith.constant 0 : i32
    %c0_i32_0 = arith.constant 0 : i32
    %c0_i32_1 = arith.constant 0 : i32
    return %c0_i32, %c0_i32_0 : i32, i32
  }
  func.func @transform_2(%arg0: i32) -> (i32, i32) {
    %c0_i32 = arith.constant 0 : i32
    %c0_i32_0 = arith.constant 0 : i32
    %c0_i32_1 = arith.constant 0 : i32
    return %c0_i32, %c0_i32_0 : i32, i32
  }
  func.func @transform_3(%arg0: i32) -> (i32, i32) {
    %c0_i32 = arith.constant 0 : i32
    %c0_i32_0 = arith.constant 0 : i32
    %c0_i32_1 = arith.constant 0 : i32
    return %c0_i32, %c0_i32_0 : i32, i32
  }
  func.func @transform_4(%arg0: i32) -> (i32, i32) {
    %c0_i32 = arith.constant 0 : i32
    %c0_i32_0 = arith.constant 0 : i32
    %c0_i32_1 = arith.constant 0 : i32
    return %c0_i32, %c0_i32_0 : i32, i32
  }
  func.func @transform_5(%arg0: i32) -> (i32, i32) {
    %c0_i32 = arith.constant 0 : i32
    %c0_i32_0 = arith.constant 0 : i32
    return %arg0, %c0_i32 : i32, i32
  }
}

</mosaic_0001>

<bundles_post_ra>
// kernel: tpu_custom_call.1
= control target key start
LH: loop header
LB: loop body
LE: loop exit
PB: predicated region body
PF: predicated region fallthrough
CT: control target
= control target key end

     0   :  { %s907_s18 = smov 0   ;;  %s1180_s0 = inlined_call_operand.vmem [shape: f32[256,10], index: 0, kind: input, shape index: {}]   ;;  %s1181_s1 = inlined_call_operand.vmem [shape: bf16[10,200], index: 1, kind: input, shape index: {}]   ;;  %s1182_s2 = inlined_call_operand.vmem [shape: f32[1,200], index: 2, kind: input, shape index: {}]   ;;  %s1183_s3 = inlined_call_operand.vmem [shape: f32[200,4], index: 3, kind: input, shape index: {}]   ;;  %s1184_s4 = inlined_call_operand.vmem [shape: f32[1,4], index: 4, kind: input, shape index: {}]   ;;  %s1185_s5 = inlined_call_operand.vmem [shape: f32[256,4], index: 5, kind: output, shape index: {}]  }
   0x1 LB: > { %s751_s19 = sadd.s32 4294967295, %s872_s18   ;;  %p755_p0 = scmp.ge.s32.totalorder %s872_s18, 1  ;;  %s872_s18 = sphi %s907_s18, %s15_s18  }
   0x2   : > { %p188_p1 = scmp.lt.s32.totalorder %s872_s18, 3 }
   0x4   : > { %p189_p2 = pnand %p755_p0, %p188_p1 }
   0x5   : > { %v863_v0 = vld [vmem:[%s1181_s1 + $0x4] ss:$8 sps:$4 sm:$0x1f] (!%p189_p2)   ;;  %vm300_vm0 = vcmask (!%p189_p2), 1044480   ;;  %s756_s24 = sshll.u32 (!%p189_p2), %s751_s19, 4  ;;  %v874_v2 = vmov (!%p189_p2), 0  }
   0x6   : > { %192 = sbr.rel (%p189_p2) target bundleno = 512 (0x200), region = 40  ;;  %v865_v1 = vld [vmem:[%s1181_s1] ss:$8 sps:$4 sm:$0x1f] (!%p189_p2)   ;;  %762 = vmatprep.subr.msk.bf16.mxu0 (!%p189_p2), %vm300_vm0, %v863_v0  ;;  %339 = vmatprep.mubr.bf16.mxu0 (!%p189_p2), %v874_v2  ;;  %p217_p3 = scmp.lt.s32.totalorder (!%p189_p2), %s756_s24, 31  ;;  %v875_v7 = vmov (!%p189_p2), 0.0|0.0  }
   0x7   : > { %v452_v3 = vld [vmem:[%s1183_s3] sm:$0xff] (!%p189_p2)  ;;  %v453_v4 = vld [vmem:[%s1183_s3 + $0x8] sm:$0xff] (!%p189_p2)  ;;  %v302_v5 = vsel (!%p189_p2), %vm300_vm0, %v865_v1, 0  ;;  %826 = vmatprep.subr.bf16.mxu1 (!%p189_p2), %v875_v7  ;;  %v454_v8 = vld [vmem:[%s1183_s3 + $0x10] sm:$0xff] (!%p189_p2)  ;;  %vm275_vm1 = vcmask (!%p189_p2), 80896   ;;  %v876_v1 = vmov (!%p189_p2), 0.0  }
   0x8   : > { %v791_v6 = vpack.c.bf16 (!%p189_p2), %v453_v4, %v452_v3  ;;  %308 = vmatpush1.bf16.msra.mxu0 (!%p189_p2), %v302_v5  ;;  %v455_v9 = vld [vmem:[%s1183_s3 + $0x18] sm:$0xff] (!%p189_p2)  ;;  %v456_v11 = vld [vmem:[%s1183_s3 + $0x20] sm:$0xff] (!%p189_p2)  ;;  %v457_v14 = vld [vmem:[%s1183_s3 + $0x28] sm:$0xff] (!%p189_p2)  ;;  %v257_v3 = vlaneseq (!%p189_p2)  ;;  %vm484_vm2 = vcmask (!%p189_p2), 588800   ;;  %vm678_vm3 = vcmask (!%p189_p2), 31744  }
   0x9   : > { %790 = vmatprep.subr.bf16.mxu0 (!%p189_p2), %v875_v7  ;;  %v794_v10 = vpack.c.bf16 (!%p189_p2), %v455_v9, %v454_v8  ;;  %v797_v16 = vpack.c.bf16 (!%p189_p2), %v457_v14, %v456_v11  ;;  %v458_v17 = vld [vmem:[%s1183_s3 + $0x30] sm:$0xff] (!%p189_p2)  ;;  %v459_v20 = vld [vmem:[%s1183_s3 + $0x38] sm:$0xff] (!%p189_p2)  ;;  %v460_v23 = vld [vmem:[%s1183_s3 + $0x40] sm:$0xff] (!%p189_p2) }
   0xa   : > { %839 = vmatpush1.bf16.msra.mxu1 (!%p189_p2), %v791_v6  ;;  %v800_v22 = vpack.c.bf16 (!%p189_p2), %v459_v20, %v458_v17  ;;  %v461_v24 = vld [vmem:[%s1183_s3 + $0x48] sm:$0xff] (!%p189_p2)  ;;  %v462_v26 = vld [vmem:[%s1183_s3 + $0x50] sm:$0xff] (!%p189_p2)  ;;  %v463_v29 = vld [vmem:[%s1183_s3 + $0x58] sm:$0xff] (!%p189_p2)  ;;  %v258_v4 = vshrl.u32 (!%p189_p2), %v257_v3, 7 }
   0xb   : > { %827 = vmatprep.subr.bf16.mxu1 (!%p189_p2), %v875_v7  ;;  %v803_v25 = vpack.c.bf16 (!%p189_p2), %v461_v24, %v460_v23  ;;  %v806_v31 = vpack.c.bf16 (!%p189_p2), %v463_v29, %v462_v26  ;;  %v464_v32 = vld [vmem:[%s1183_s3 + $0x60] sm:$0xff] (!%p189_p2)  ;;  %v465_v33 = vld [vmem:[%s1183_s3 + $0x68] sm:$0xff] (!%p189_p2)  ;;  %v466_v35 = vld [vmem:[%s1183_s3 + $0x70] sm:$0xff] (!%p189_p2) }
   0xc   : > { %v809_v34 = vpack.c.bf16 (!%p189_p2), %v465_v33, %v464_v32  ;;  %v467_v38 = vld [vmem:[%s1183_s3 + $0x78] sm:$0xff] (!%p189_p2)  ;;  %v468_v41 = vld [vmem:[%s1183_s3 + $0x80] sm:$0xff] (!%p189_p2)  ;;  %v469_v42 = vld [vmem:[%s1183_s3 + $0x88] sm:$0xff] (!%p189_p2)  ;;  %v259_v5 = vsub.s32 (!%p189_p2), 0, %v258_v4 }
   0xd   : > { %s1187_s24 = smov (!%p217_p3, %s756_s24), 31  ;;  %v812_v40 = vpack.c.bf16 %v467_v38, %v466_v35  ;;  %v815_v44 = vpack.c.bf16 %v469_v42, %v468_v41  ;;  %v470_v46 = vld [vmem:[%s1183_s3 + $0x90] sm:$0xff]  ;;  %v471_v47 = vld [vmem:[%s1183_s3 + $0x98] sm:$0xff]  ;;  %v472_v50 = vld [vmem:[%s1183_s3 + $0xa0] sm:$0xff] }
   0xe   : > { %s757_s8 = sshll.u32 %s1187_s24, 3  ;;  %840 = vmatpush1.bf16.msra.mxu1 %v794_v10  ;;  %v818_v49 = vpack.c.bf16 %v471_v47, %v470_v46  ;;  %v473_v51 = vld [vmem:[%s1183_s3 + $0xa8] sm:$0xff]  ;;  %v474_v62 = vld [vmem:[%s1183_s3 + $0xb0] sm:$0xff]  ;;  %v475_v63 = vld [vmem:[%s1183_s3 + $0xb8] sm:$0xff] }
   0xf   : > { %s945_s11 = scalar_lea.vmem %s1180_s0, %s757_s8  ;;  %828 = vmatprep.subr.bf16.mxu1 %v875_v7  ;;  %v821_v52 = vpack.c.bf16 %v473_v51, %v472_v50  ;;  %v824_v0 = vpack.c.bf16 %v475_v63, %v474_v62  ;;  %s1127_s17 = scalar_lea.vmem %s1185_s5, %s757_s8 }
  0x10   : > { %v229_v12 = vld [vmem:[%s945_s11] sm:$0xff]  ;;  %v230_v13 = vld [vmem:[%s945_s11 + $0x8] sm:$0xff]  ;;  %v231_v18 = vld [vmem:[%s945_s11 + $0x10] sm:$0xff] }
  0x11   : > { %v245_v15 = vpack.c.bf16 %v230_v13, %v229_v12  ;;  %v232_v19 = vld [vmem:[%s945_s11 + $0x18] sm:$0xff]  ;;  %v233_v27 = vld [vmem:[%s945_s11 + $0x20] sm:$0xff]  ;;  %v234_v28 = vld [vmem:[%s945_s11 + $0x28] sm:$0xff] }
  0x12   : > { %841 = vmatpush1.bf16.msra.mxu1 %v797_v16  ;;  %v246_v21 = vpack.c.bf16 %v232_v19, %v231_v18  ;;  %v247_v30 = vpack.c.bf16 %v234_v28, %v233_v27  ;;  %v235_v36 = vld [vmem:[%s945_s11 + $0x30] sm:$0xff]  ;;  %v236_v37 = vld [vmem:[%s945_s11 + $0x38] sm:$0xff]  ;;  %v237_v43 = vld [vmem:[%s945_s11 + $0x40] sm:$0xff] }
  0x13   : > { %763 = vmatmul.mubr.msk.bf16.vlgmr.msra.gmra.mrb[0].mxu0 %vm275_vm1, %v245_v15  ;;  %829 = vmatprep.subr.bf16.mxu1 %v875_v7  ;;  %v248_v39 = vpack.c.bf16 %v236_v37, %v235_v36  ;;  %v238_v45 = vld [vmem:[%s945_s11 + $0x48] sm:$0xff]  ;;  %v239_v53 = vld [vmem:[%s945_s11 + $0x50] sm:$0xff]  ;;  %v240_v54 = vld [vmem:[%s945_s11 + $0x58] sm:$0xff] }
  0x14   : > { %349 = vmatprep.mubr.bf16.mxu0 %v874_v2  ;;  %792 = vmatpush1.bf16.msra.mxu0 %v791_v6  ;;  %v249_v48 = vpack.c.bf16 %v238_v45, %v237_v43  ;;  %v250_v55 = vpack.c.bf16 %v240_v54, %v239_v53  ;;  %v241_v56 = vld [vmem:[%s945_s11 + $0x60] sm:$0xff]  ;;  %v242_v57 = vld [vmem:[%s945_s11 + $0x68] sm:$0xff]  ;;  %v243_v59 = vld [vmem:[%s945_s11 + $0x70] sm:$0xff] }
  0x15   : > { %793 = vmatprep.subr.bf16.mxu0 %v875_v7  ;;  %v251_v58 = vpack.c.bf16 %v242_v57, %v241_v56  ;;  %v244_v60 = vld [vmem:[%s945_s11 + $0x78] sm:$0xff]  ;;  %v255_v6 = vld [vmem:[%s1182_s2] sm:$0x3] }
  0x16   : > { %842 = vmatpush1.bf16.msra.mxu1 %v800_v22  ;;  %v252_v61 = vpack.c.bf16 %v244_v60, %v243_v59  ;;  %v1065_v8 = vrot.slane %v255_v6, %v259_v5 }
  0x17   : > { %830 = vmatprep.subr.bf16.mxu1 %v875_v7 }
  0x18   : > { %795 = vmatpush1.bf16.msra.mxu0 %v794_v10 }
  0x19   : > { %796 = vmatprep.subr.bf16.mxu0 %v875_v7 }
  0x1a   : > { %843 = vmatpush1.bf16.msra.mxu1 %v803_v25 }
  0x1b   : > { %764 = vmatmul.mubr.msk.bf16.gmra.mrb[4].mxu0 %vm275_vm1, %v246_v21  ;;  %831 = vmatprep.subr.bf16.mxu1 %v875_v7 }
  0x1c   : > { %359 = vmatprep.mubr.bf16.mxu0 %v874_v2  ;;  %798 = vmatpush1.bf16.msra.mxu0 %v797_v16 }
  0x1d   : > { %799 = vmatprep.subr.bf16.mxu0 %v875_v7 }
  0x1e   : > { %844 = vmatpush1.bf16.msra.mxu1 %v806_v31 }
  0x1f   : > { %832 = vmatprep.subr.bf16.mxu1 %v875_v7 }
  0x20   : > { %801 = vmatpush1.bf16.msra.mxu0 %v800_v22 }
  0x21   : > { %802 = vmatprep.subr.bf16.mxu0 %v875_v7 }
  0x22   : > { %845 = vmatpush1.bf16.msra.mxu1 %v809_v34 }
  0x23   : > { %765 = vmatmul.mubr.msk.bf16.gmra.mrb[8].mxu0 %vm275_vm1, %v247_v30  ;;  %833 = vmatprep.subr.bf16.mxu1 %v875_v7 }
  0x24   : > { %369 = vmatprep.mubr.bf16.mxu0 %v874_v2  ;;  %804 = vmatpush1.bf16.msra.mxu0 %v803_v25 }
  0x25   : > { %805 = vmatprep.subr.bf16.mxu0 %v875_v7 }
  0x26   : > { %846 = vmatpush1.bf16.msra.mxu1 %v812_v40 }
  0x27   : > { %834 = vmatprep.subr.bf16.mxu1 %v875_v7 }
  0x28   : > { %807 = vmatpush1.bf16.msra.mxu0 %v806_v31 }
  0x29   : > { %808 = vmatprep.subr.bf16.mxu0 %v875_v7 }
  0x2a   : > { %847 = vmatpush1.bf16.msra.mxu1 %v815_v44 }
  0x2b   : > { %766 = vmatmul.mubr.msk.bf16.gmra.mrb[12].mxu0 %vm275_vm1, %v248_v39  ;;  %835 = vmatprep.subr.bf16.mxu1 %v875_v7 }
  0x2c   : > { %379 = vmatprep.mubr.bf16.mxu0 %v874_v2  ;;  %810 = vmatpush1.bf16.msra.mxu0 %v809_v34 }
  0x2d   : > { %811 = vmatprep.subr.bf16.mxu0 %v875_v7 }
  0x2e   : > { %848 = vmatpush1.bf16.msra.mxu1 %v818_v49 }
  0x2f   : > { %836 = vmatprep.subr.bf16.mxu1 %v875_v7 }
  0x30   : > { %813 = vmatpush1.bf16.msra.mxu0 %v812_v40 }
  0x31   : > { %814 = vmatprep.subr.bf16.mxu0 %v875_v7 }
  0x32   : > { %849 = vmatpush1.bf16.msra.mxu1 %v821_v52 }
  0x33   : > { %767 = vmatmul.mubr.msk.bf16.gmra.mrb[16].mxu0 %vm275_vm1, %v249_v48  ;;  %837 = vmatprep.subr.bf16.mxu1 %v875_v7 }
  0x34   : > { %389 = vmatprep.mubr.bf16.mxu0 %v874_v2  ;;  %816 = vmatpush1.bf16.msra.mxu0 %v815_v44 }
  0x35   : > { %817 = vmatprep.subr.bf16.mxu0 %v875_v7 }
  0x36   : > { %850 = vmatpush1.bf16.msra.mxu1 %v824_v0 }
  0x37   : > { %838 = vmatprep.subr.mxu1 %v876_v1 }
  0x38   : > { %819 = vmatpush1.bf16.msra.mxu0 %v818_v49 }
  0x39   : > { %820 = vmatprep.subr.bf16.mxu0 %v875_v7 }
  0x3b   : > { %768 = vmatmul.mubr.msk.bf16.gmra.mrb[20].mxu0 %vm275_vm1, %v250_v55 }
  0x3c   : > { %399 = vmatprep.mubr.bf16.mxu0 %v874_v2  ;;  %822 = vmatpush1.bf16.msra.mxu0 %v821_v52 }
  0x3d   : > { %823 = vmatprep.subr.bf16.mxu0 %v875_v7  ;;  %v263_v7 = vsub.s32 1, %v258_v4 }
  0x3f   : > { %v1067_v9 = vrot.slane %v255_v6, %v263_v7 }
  0x40   : > { %825 = vmatpush1.bf16.msra.mxu0 %v824_v0 }
  0x41   : > { %581 = vmatprep.subr.mxu0 %v876_v1 }
  0x43   : > { %769 = vmatmul.mubr.msk.bf16.gmra.mrb[24].mxu0 %vm275_vm1, %v251_v58 }
  0x44   : > { %409 = vmatprep.mubr.bf16.mxu0 %v874_v2  ;;  %v476_v2 = vld [vmem:[%s1183_s3 + $0xc0] sm:$0xff] }
  0x45   : > { %582 = vmatpush1.msra.mxu0 %v476_v2  ;;  %851 = vmatpush1.msra.mxu1 %v476_v2 }
  0x4b   : > { %770 = vmatmul.mubr.msk.bf16.gmra.mrb[28].mxu0 %vm275_vm1, %v252_v61 }
  0xe6   : > { %v341_v10 = vpop.f32.mrb[0].mxu0 }
  0xe7   : > { %v342_v11 = vadd.f32 %v341_v10, %v1065_v8  ;;  %v343_v12 = vpop.f32.mrb[1].mxu0 }
  0xe8   : > { %v344_v13 = vadd.f32 %v343_v12, %v1067_v9  ;;  %v345_v14 = vpop.f32.mrb[2].mxu0 }
  0xe9   : > { %v347_v15 = vpop.f32.mrb[3].mxu0  ;;  %v420_v18 = vmax.f32 %v342_v11, 0.0  ;;  %v346_v19 = vadd.f32 %v345_v14, %v1065_v8 }
  0xea   : > { %v421_v16 = vmax.f32 %v344_v13, 0.0  ;;  %v348_v17 = vadd.f32 %v347_v15, %v1067_v9 }
  0xeb   : > { %v422_v22 = vmax.f32 %v346_v19, 0.0 }
  0xec   : > { %v423_v20 = vmax.f32 %v348_v17, 0.0  ;;  %772 = vmatprep.mubr.msk.f32.mxu0 %vm484_vm2, %v421_v16 }
  0xed   : > { %598 = vmatmul.mubr.f32.vlgmr.msra.gmra.mrb[32].mxu0 %v420_v18 }
  0xee   : > { %v351_v21 = vpop.f32.mrb[4].mxu0  ;;  %773 = vmatprep.mubr.msk.f32.mxu0 %vm484_vm2, %v423_v20 }
  0xef   : > { %v352_v23 = vadd.f32 %v351_v21, %v1065_v8  ;;  %v353_v24 = vpop.f32.mrb[5].mxu0 }
  0xf0   : > { %v354_v25 = vadd.f32 %v353_v24, %v1067_v9  ;;  %v355_v26 = vpop.f32.mrb[6].mxu0 }
  0xf1   : > { %v357_v27 = vpop.f32.mrb[7].mxu0  ;;  %603 = vmatmul.mubr.f32.gmra.mrb[34].mxu0 %v422_v22  ;;  %v424_v30 = vmax.f32 %v352_v23, 0.0  ;;  %v356_v31 = vadd.f32 %v355_v26, %v1065_v8 }
  0xf2   : > { %v425_v28 = vmax.f32 %v354_v25, 0.0  ;;  %v358_v29 = vadd.f32 %v357_v27, %v1067_v9 }
  0xf3   : > { %v426_v34 = vmax.f32 %v356_v31, 0.0 }
  0xf4   : > { %v427_v32 = vmax.f32 %v358_v29, 0.0  ;;  %774 = vmatprep.mubr.msk.f32.mxu0 %vm484_vm2, %v425_v28 }
  0xf5   : > { %608 = vmatmul.mubr.f32.gmra.mrb[36].mxu0 %v424_v30 }
  0xf6   : > { %v361_v33 = vpop.f32.mrb[8].mxu0  ;;  %775 = vmatprep.mubr.msk.f32.mxu0 %vm484_vm2, %v427_v32 }
  0xf7   : > { %v362_v35 = vadd.f32 %v361_v33, %v1065_v8  ;;  %v363_v36 = vpop.f32.mrb[9].mxu0 }
  0xf8   : > { %v364_v37 = vadd.f32 %v363_v36, %v1067_v9  ;;  %v365_v38 = vpop.f32.mrb[10].mxu0 }
  0xf9   : > { %v366_v39 = vadd.f32 %v365_v38, %v1065_v8  ;;  %v367_v40 = vpop.f32.mrb[11].mxu0  ;;  %613 = vmatmul.mubr.f32.gmra.mrb[38].mxu0 %v426_v34  ;;  %v428_v43 = vmax.f32 %v362_v35, 0.0 }
  0xfa   : > { %v429_v41 = vmax.f32 %v364_v37, 0.0  ;;  %v368_v42 = vadd.f32 %v367_v40, %v1067_v9 }
  0xfb   : > { %v430_v45 = vmax.f32 %v366_v39, 0.0 }
  0xfc   : > { %v431_v44 = vmax.f32 %v368_v42, 0.0  ;;  %776 = vmatprep.mubr.msk.f32.mxu0 %vm484_vm2, %v429_v41 }
  0xfd   : > { %618 = vmatmul.mubr.f32.gmra.mrb[40].mxu0 %v428_v43 }
  0xfe   : > { %v371_v46 = vpop.f32.mrb[12].mxu0  ;;  %777 = vmatprep.mubr.msk.f32.mxu1 %vm484_vm2, %v431_v44  ;;  %v1120_v44 = vld [vmem:[%s1184_s4] ss:$0 sm:$0xff] }
  0xff   : > { %v372_v47 = vadd.f32 %v371_v46, %v1065_v8  ;;  %v373_v48 = vpop.f32.mrb[13].mxu0  ;;  %623 = vmatmul.mubr.f32.vlgmr.msra.gmra.mrb[0].mxu1 %v430_v45 }
 0x100   : > { %v374_v49 = vadd.f32 %v373_v48, %v1067_v9  ;;  %v375_v50 = vpop.f32.mrb[14].mxu0 }
 0x101   : > { %v377_v51 = vpop.f32.mrb[15].mxu0  ;;  %v432_v54 = vmax.f32 %v372_v47, 0.0  ;;  %v376_v55 = vadd.f32 %v375_v50, %v1065_v8 }
 0x102   : > { %v433_v52 = vmax.f32 %v374_v49, 0.0  ;;  %v378_v53 = vadd.f32 %v377_v51, %v1067_v9 }
 0x103   : > { %v434_v58 = vmax.f32 %v376_v55, 0.0 }
 0x104   : > { %v435_v56 = vmax.f32 %v378_v53, 0.0  ;;  %778 = vmatprep.mubr.msk.f32.mxu1 %vm484_vm2, %v433_v52 }
 0x105   : > { %628 = vmatmul.mubr.f32.gmra.mrb[2].mxu1 %v432_v54 }
 0x106   : > { %v381_v57 = vpop.f32.mrb[16].mxu0  ;;  %779 = vmatprep.mubr.msk.f32.mxu1 %vm484_vm2, %v435_v56 }
 0x107   : > { %v382_v59 = vadd.f32 %v381_v57, %v1065_v8  ;;  %v383_v60 = vpop.f32.mrb[17].mxu0 }
 0x108   : > { %v384_v61 = vadd.f32 %v383_v60, %v1067_v9  ;;  %v385_v62 = vpop.f32.mrb[18].mxu0 }
 0x109   : > { %v387_v63 = vpop.f32.mrb[19].mxu0  ;;  %633 = vmatmul.mubr.f32.gmra.mrb[4].mxu1 %v434_v58  ;;  %v436_v2 = vmax.f32 %v382_v59, 0.0  ;;  %v386_v3 = vadd.f32 %v385_v62, %v1065_v8 }
 0x10a   : > { %v437_v0 = vmax.f32 %v384_v61, 0.0  ;;  %v388_v1 = vadd.f32 %v387_v63, %v1067_v9 }
 0x10b   : > { %v438_v6 = vmax.f32 %v386_v3, 0.0 }
 0x10c   : > { %v439_v4 = vmax.f32 %v388_v1, 0.0  ;;  %780 = vmatprep.mubr.msk.f32.mxu1 %vm484_vm2, %v437_v0 }
 0x10d   : > { %638 = vmatmul.mubr.f32.gmra.mrb[6].mxu1 %v436_v2 }
 0x10e   : > { %v391_v5 = vpop.f32.mrb[20].mxu0  ;;  %781 = vmatprep.mubr.msk.f32.mxu1 %vm484_vm2, %v439_v4 }
 0x10f   : > { %v392_v7 = vadd.f32 %v391_v5, %v1065_v8  ;;  %v393_v10 = vpop.f32.mrb[21].mxu0 }
 0x110   : > { %v394_v11 = vadd.f32 %v393_v10, %v1067_v9  ;;  %v395_v12 = vpop.f32.mrb[22].mxu0 }
 0x111   : > { %v397_v13 = vpop.f32.mrb[23].mxu0  ;;  %643 = vmatmul.mubr.f32.gmra.mrb[8].mxu1 %v438_v6  ;;  %v440_v16 = vmax.f32 %v392_v7, 0.0  ;;  %v396_v17 = vadd.f32 %v395_v12, %v1065_v8 }
 0x112   : > { %v441_v14 = vmax.f32 %v394_v11, 0.0  ;;  %v398_v15 = vadd.f32 %v397_v13, %v1067_v9 }
 0x113   : > { %v442_v20 = vmax.f32 %v396_v17, 0.0 }
 0x114   : > { %v443_v18 = vmax.f32 %v398_v15, 0.0  ;;  %782 = vmatprep.mubr.msk.f32.mxu1 %vm484_vm2, %v441_v14 }
 0x115   : > { %648 = vmatmul.mubr.f32.gmra.mrb[10].mxu1 %v440_v16 }
 0x116   : > { %v401_v19 = vpop.f32.mrb[24].mxu0  ;;  %783 = vmatprep.mubr.msk.f32.mxu1 %vm484_vm2, %v443_v18 }
 0x117   : > { %v402_v21 = vadd.f32 %v401_v19, %v1065_v8  ;;  %v403_v22 = vpop.f32.mrb[25].mxu0 }
 0x118   : > { %v404_v23 = vadd.f32 %v403_v22, %v1067_v9  ;;  %v405_v24 = vpop.f32.mrb[26].mxu0 }
 0x119   : > { %v407_v25 = vpop.f32.mrb[27].mxu0  ;;  %653 = vmatmul.mubr.f32.gmra.mrb[12].mxu1 %v442_v20  ;;  %v444_v28 = vmax.f32 %v402_v21, 0.0  ;;  %v406_v29 = vadd.f32 %v405_v24, %v1065_v8 }
 0x11a   : > { %v445_v26 = vmax.f32 %v404_v23, 0.0  ;;  %v408_v27 = vadd.f32 %v407_v25, %v1067_v9 }
 0x11b   : > { %v446_v32 = vmax.f32 %v406_v29, 0.0 }
 0x11c   : > { %v447_v30 = vmax.f32 %v408_v27, 0.0  ;;  %784 = vmatprep.mubr.msk.f32.mxu1 %vm484_vm2, %v445_v26 }
 0x11d   : > { %658 = vmatmul.mubr.f32.gmra.mrb[14].mxu1 %v444_v28 }
 0x11e   : > { %v411_v31 = vpop.f32.mrb[28].mxu0  ;;  %785 = vmatprep.mubr.msk.f32.mxu1 %vm484_vm2, %v447_v30 }
 0x11f   : > { %v412_v33 = vadd.f32 %v411_v31, %v1065_v8  ;;  %v413_v34 = vpop.f32.mrb[29].mxu0 }
 0x120   : > { %v414_v35 = vadd.f32 %v413_v34, %v1067_v9  ;;  %v415_v36 = vpop.f32.mrb[30].mxu0 }
 0x121   : > { %v417_v37 = vpop.f32.mrb[31].mxu0  ;;  %663 = vmatmul.mubr.f32.gmra.mrb[16].mxu1 %v446_v32  ;;  %v448_v40 = vmax.f32 %v412_v33, 0.0  ;;  %v416_v41 = vadd.f32 %v415_v36, %v1065_v8 }
 0x122   : > { %v449_v38 = vmax.f32 %v414_v35, 0.0  ;;  %v418_v39 = vadd.f32 %v417_v37, %v1067_v9 }
 0x123   : > { %v450_v43 = vmax.f32 %v416_v41, 0.0 }
 0x124   : > { %v451_v42 = vmax.f32 %v418_v39, 0.0  ;;  %786 = vmatprep.mubr.msk.f32.mxu1 %vm484_vm2, %v449_v38 }
 0x125   : > { %668 = vmatmul.mubr.f32.gmra.mrb[18].mxu1 %v448_v40 }
 0x126   : > { %787 = vmatprep.mubr.msk.f32.mxu1 %vm484_vm2, %v451_v42 }
 0x129   : > { %673 = vmatmul.mubr.f32.gmra.mrb[20].mxu1 %v450_v43 }
 0x1c0   : > { %v599_v8 = vpop.f32.mrb[32].mxu0 }
 0x1c1   : > { %v600_v9 = vadd.f32 %v1120_v44, %v599_v8  ;;  %v601_v45 = vpop.f32.mrb[33].mxu0 }
 0x1c3   : > { %679 = vst.msk [vmem:[%s1127_s17] sm:$0xff] %vm678_vm3, %v600_v9 }
 0x1c4   : > { %v604_v46 = vpop.f32.mrb[34].mxu0 }
 0x1c5   : > { %v605_v47 = vadd.f32 %v1120_v44, %v604_v46  ;;  %v606_v48 = vpop.f32.mrb[35].mxu0 }
 0x1c7   : > { %680 = vst.msk [vmem:[%s1127_s17 + $0x8] sm:$0xff] %vm678_vm3, %v605_v47 }
 0x1c8   : > { %v609_v49 = vpop.f32.mrb[36].mxu0 }
 0x1c9   : > { %v610_v50 = vadd.f32 %v1120_v44, %v609_v49  ;;  %v611_v51 = vpop.f32.mrb[37].mxu0 }
 0x1cb   : > { %681 = vst.msk [vmem:[%s1127_s17 + $0x10] sm:$0xff] %vm678_vm3, %v610_v50 }
 0x1cc   : > { %v614_v52 = vpop.f32.mrb[38].mxu0 }
 0x1cd   : > { %v615_v53 = vadd.f32 %v1120_v44, %v614_v52  ;;  %v616_v54 = vpop.f32.mrb[39].mxu0 }
 0x1cf   : > { %682 = vst.msk [vmem:[%s1127_s17 + $0x18] sm:$0xff] %vm678_vm3, %v615_v53 }
 0x1d0   : > { %v619_v55 = vpop.f32.mrb[40].mxu0 }
 0x1d1   : > { %v620_v56 = vadd.f32 %v1120_v44, %v619_v55  ;;  %v621_v57 = vpop.f32.mrb[41].mxu0 }
 0x1d2   : > { %v624_v58 = vpop.f32.mrb[0].mxu1 }
 0x1d3   : > { %683 = vst.msk [vmem:[%s1127_s17 + $0x20] sm:$0xff] %vm678_vm3, %v620_v56  ;;  %v625_v59 = vadd.f32 %v1120_v44, %v624_v58  ;;  %v626_v60 = vpop.f32.mrb[1].mxu1 }
 0x1d5   : > { %684 = vst.msk [vmem:[%s1127_s17 + $0x28] sm:$0xff] %vm678_vm3, %v625_v59 }
 0x1d8   : > { %v629_v61 = vpop.f32.mrb[2].mxu1 }
 0x1d9   : > { %v630_v62 = vadd.f32 %v1120_v44, %v629_v61  ;;  %v631_v63 = vpop.f32.mrb[3].mxu1 }
 0x1db   : > { %685 = vst.msk [vmem:[%s1127_s17 + $0x30] sm:$0xff] %vm678_vm3, %v630_v62 }
 0x1dc   : > { %v634_v0 = vpop.f32.mrb[4].mxu1 }
 0x1dd   : > { %v635_v1 = vadd.f32 %v1120_v44, %v634_v0  ;;  %v636_v2 = vpop.f32.mrb[5].mxu1 }
 0x1df   : > { %686 = vst.msk [vmem:[%s1127_s17 + $0x38] sm:$0xff] %vm678_vm3, %v635_v1 }
 0x1e0   : > { %v639_v3 = vpop.f32.mrb[6].mxu1 }
 0x1e1   : > { %v640_v4 = vadd.f32 %v1120_v44, %v639_v3  ;;  %v641_v5 = vpop.f32.mrb[7].mxu1 }
 0x1e3   : > { %687 = vst.msk [vmem:[%s1127_s17 + $0x40] sm:$0xff] %vm678_vm3, %v640_v4 }
 0x1e4   : > { %v644_v6 = vpop.f32.mrb[8].mxu1 }
 0x1e5   : > { %v645_v7 = vadd.f32 %v1120_v44, %v644_v6  ;;  %v646_v10 = vpop.f32.mrb[9].mxu1 }
 0x1e7   : > { %688 = vst.msk [vmem:[%s1127_s17 + $0x48] sm:$0xff] %vm678_vm3, %v645_v7 }
 0x1e8   : > { %v649_v11 = vpop.f32.mrb[10].mxu1 }
 0x1e9   : > { %v650_v12 = vadd.f32 %v1120_v44, %v649_v11  ;;  %v651_v13 = vpop.f32.mrb[11].mxu1 }
 0x1eb   : > { %689 = vst.msk [vmem:[%s1127_s17 + $0x50] sm:$0xff] %vm678_vm3, %v650_v12 }
 0x1ec   : > { %v654_v14 = vpop.f32.mrb[12].mxu1 }
 0x1ed   : > { %v655_v15 = vadd.f32 %v1120_v44, %v654_v14  ;;  %v656_v16 = vpop.f32.mrb[13].mxu1 }
 0x1ef   : > { %690 = vst.msk [vmem:[%s1127_s17 + $0x58] sm:$0xff] %vm678_vm3, %v655_v15 }
 0x1f0   : > { %v659_v17 = vpop.f32.mrb[14].mxu1 }
 0x1f1   : > { %v660_v18 = vadd.f32 %v1120_v44, %v659_v17  ;;  %v661_v19 = vpop.f32.mrb[15].mxu1 }
 0x1f3   : > { %691 = vst.msk [vmem:[%s1127_s17 + $0x60] sm:$0xff] %vm678_vm3, %v660_v18 }
 0x1f4   : > { %v664_v20 = vpop.f32.mrb[16].mxu1 }
 0x1f5   : > { %v665_v21 = vadd.f32 %v1120_v44, %v664_v20  ;;  %v666_v22 = vpop.f32.mrb[17].mxu1 }
 0x1f7   : > { %692 = vst.msk [vmem:[%s1127_s17 + $0x68] sm:$0xff] %vm678_vm3, %v665_v21 }
 0x1f8   : > { %v669_v23 = vpop.f32.mrb[18].mxu1 }
 0x1f9   : > { %v670_v24 = vadd.f32 %v1120_v44, %v669_v23  ;;  %v671_v25 = vpop.f32.mrb[19].mxu1 }
 0x1fb   : > { %693 = vst.msk [vmem:[%s1127_s17 + $0x70] sm:$0xff] %vm678_vm3, %v670_v24 }
 0x1fc   : > { %v674_v26 = vpop.f32.mrb[20].mxu1 }
 0x1fd   : > { %v675_v27 = vadd.f32 %v1120_v44, %v674_v26  ;;  %v676_v28 = vpop.f32.mrb[21].mxu1 }
 0x1ff   : > { %694 = vst.msk [vmem:[%s1127_s17 + $0x78] sm:$0xff] %vm678_vm3, %v675_v27 }
 0x200 PF: > { %s15_s18 = sadd.s32 1, %s872_s18  }
 0x201   : > { %p12_p4 = scmp.ge.s32.totalorder %s15_s18, 4  }
 0x203   :  { %14 = sbr.rel (!%p12_p4) target bundleno = 1 (0x1), region = 70 }

</bundles_post_ra>
